<compile_context>
chip_gen: v6e
topology: v6e:2x2x1
jax: 0.10.0
libtpu: 0.0.40
codegen_flags: <defaults>
</compile_context>

<pallas_src>
import jax
import jax.numpy as jnp
from jax.experimental import pallas as pl
from jax.experimental.pallas import tpu as pltpu


# ---------------------------------------------------------------------------
# Stage 1: xw = x @ W for both branches (reassociated linear, no bias yet).
# ---------------------------------------------------------------------------
def _xw_kernel(x_ref, we_ref, wa_ref, xwe_ref, xwa_ref):
    x = x_ref[...]                                                   # (B, tn, F)
    xwe_ref[...] = jnp.einsum('bnf,fh->bnh', x, we_ref[...],
                              preferred_element_type=jnp.float32)    # (B, tn, H)
    xwa_ref[...] = jnp.einsum('bnf,fk->bnk', x, wa_ref[...],
                              preferred_element_type=jnp.float32)    # (B, tn, K)


# ---------------------------------------------------------------------------
# Stage 2: per node-row tile: h = adj_tile @ xw + b ; normalize ; relu ; BN ;
#          (softmax on the assignment branch).  Everything after the matmul is
#          per-node, so a (B, tn, :) tile is fully self-contained.
# ---------------------------------------------------------------------------
def _sage_kernel(adj_ref, xwe_ref, xwa_ref, be_ref, ba_ref, z_ref, s_ref):
    adj_t = adj_ref[...]                                             # (B, tn, N)

    # GraphSAGE aggregation, reassociated: adj @ (x @ W), bias added afterwards.
    he = jnp.einsum('bmn,bnh->bmh', adj_t, xwe_ref[...],
                    preferred_element_type=jnp.float32) + be_ref[...]    # (B, tn, H)
    ha = jnp.einsum('bmn,bnk->bmk', adj_t, xwa_ref[...],
                    preferred_element_type=jnp.float32) + ba_ref[...]    # (B, tn, K)

    def norm_relu(t):
        # F.normalize(p=2, dim=-1, eps=1e-12) == t * rsqrt(max(sum(t^2), eps^2))
        ssq = jnp.sum(t * t, axis=-1, keepdims=True)
        t = t * jax.lax.rsqrt(jnp.maximum(ssq, 1e-24))
        return jnp.maximum(t, 0.0)

    he = norm_relu(he)
    ha = norm_relu(ha)

    def bn_stats(t):
        # Train-mode BatchNorm1d(N): per-node stats over (batch, feature), biased var.
        cnt = jnp.float32(t.shape[0] * t.shape[2])
        s1 = jnp.sum(jnp.sum(t, axis=2, keepdims=True), axis=0, keepdims=True)
        mean = s1 / cnt
        s2 = jnp.sum(jnp.sum(t * t, axis=2, keepdims=True), axis=0, keepdims=True)
        var = s2 / cnt - mean * mean          # single-pass E[x^2] - mean^2
        inv = jax.lax.rsqrt(var + 1e-5)       # affine weight=1, bias=0
        return mean, inv

    mean_e, inv_e = bn_stats(he)
    z_ref[...] = (he - mean_e) * inv_e

    _, inv_a = bn_stats(ha)
    # softmax over K is invariant to the per-node BN mean shift -> only the scale matters.
    t = ha * inv_a
    m = jnp.max(t, axis=-1, keepdims=True)
    e = jnp.exp(t - m)
    denom = jnp.sum(e, axis=-1, keepdims=True)
    s_ref[...] = e * pl.reciprocal(denom, approx=True)


# ---------------------------------------------------------------------------
# Stage 3: pooling per graph: xnext = s^T z ; anext = s^T adj s.
# ---------------------------------------------------------------------------
def _pool_kernel(s_ref, z_ref, adj_ref, xnext_ref, anext_ref):
    s = s_ref[...]                                                   # (N, K)
    z = z_ref[...]                                                   # (N, H)
    a = adj_ref[...]                                                 # (N, N)
    xnext_ref[...] = jnp.einsum('nk,nh->kh', s, z,
                                preferred_element_type=jnp.float32)  # (K, H)
    a_s = jnp.dot(a, s, preferred_element_type=jnp.float32)          # (N, K)
    anext_ref[...] = jnp.einsum('nk,nc->kc', s, a_s,
                                preferred_element_type=jnp.float32)  # (K, K)


# ---------------------------------------------------------------------------
# Wrapper
# ---------------------------------------------------------------------------
def _pick_node_tile(B, N, C, vmem_budget_bytes=20 * 1024 * 1024):
    """Largest node tile (multiple of 8, dividing N) whose working set fits the budget."""
    if N % 8 != 0:
        return N  # fall back to one full-N block (still a legal BlockSpec)
    best, tn = 8, 8
    while tn <= min(N, 1024):
        if N % tn == 0:
            need = (2 * B * tn * N * 4            # double-buffered adj tile
                    + 2 * B * N * C * 4           # resident xw blocks
                    + 4 * B * tn * C * 4)         # double-buffered output tiles
            if need <= vmem_budget_bytes:
                best = tn
        tn *= 2
    return best


def batched_diff_pool(x, adj, w_embed, b_embed, w_assign, b_assign, *, node_tile=None):
    """x:(B,N,F), adj:(B,N,N), w_embed:(F,H), b_embed:(H,), w_assign:(F,K), b_assign:(K,).
    Returns (xnext:(B,K,H), anext:(B,K,K), s_l:(B,N,K), z_l:(B,N,H))."""
    B, N, F = x.shape
    H = w_embed.shape[1]
    K = w_assign.shape[1]
    C = H + K

    tn = node_tile if node_tile is not None else _pick_node_tile(B, N, C)
    assert N % tn == 0, f"node tile {tn} must divide N={N}"
    grid_n = N // tn

    be = b_embed.reshape(1, 1, H).astype(jnp.float32)
    ba = b_assign.reshape(1, 1, K).astype(jnp.float32)

    # 32 MiB scoped VMEM is safe on v5e/v6e/v7x; tiles are budgeted well below it.
    cparams = pltpu.CompilerParams(dimension_semantics=("parallel",),
                                   vmem_limit_bytes=32 * 1024 * 1024)

    # --- Stage 1: xw = x @ W (both branches) ---
    xwe, xwa = pl.pallas_call(
        _xw_kernel,
        out_shape=(jax.ShapeDtypeStruct((B, N, H), jnp.float32),
                   jax.ShapeDtypeStruct((B, N, K), jnp.float32)),
        grid=(grid_n,),
        in_specs=[pl.BlockSpec((B, tn, F), lambda i: (0, i, 0)),
                  pl.BlockSpec((F, H), lambda i: (0, 0)),
                  pl.BlockSpec((F, K), lambda i: (0, 0))],
        out_specs=(pl.BlockSpec((B, tn, H), lambda i: (0, i, 0)),
                   pl.BlockSpec((B, tn, K), lambda i: (0, i, 0))),
        compiler_params=cparams,
        cost_estimate=pl.CostEstimate(
            flops=2 * B * N * F * C,
            transcendentals=0,
            bytes_accessed=4 * (B * N * F + F * C + B * N * C)),
    )(x, w_embed, w_assign)

    # --- Stage 2: GraphSAGE aggregation + normalize/relu/BN (+ softmax) per node tile ---
    z_l, s_l = pl.pallas_call(
        _sage_kernel,
        out_shape=(jax.ShapeDtypeStruct((B, N, H), jnp.float32),
                   jax.ShapeDtypeStruct((B, N, K), jnp.float32)),
        grid=(grid_n,),
        in_specs=[pl.BlockSpec((B, tn, N), lambda i: (0, i, 0)),
                  pl.BlockSpec((B, N, H), lambda i: (0, 0, 0)),
                  pl.BlockSpec((B, N, K), lambda i: (0, 0, 0)),
                  pl.BlockSpec((1, 1, H), lambda i: (0, 0, 0)),
                  pl.BlockSpec((1, 1, K), lambda i: (0, 0, 0))],
        out_specs=(pl.BlockSpec((B, tn, H), lambda i: (0, i, 0)),
                   pl.BlockSpec((B, tn, K), lambda i: (0, i, 0))),
        compiler_params=cparams,
        cost_estimate=pl.CostEstimate(
            flops=2 * B * N * N * C + 12 * B * N * C,
            transcendentals=B * N * (K + 4),
            bytes_accessed=4 * (B * N * N + 2 * B * N * C + C)),
    )(adj, xwe, xwa, be, ba)

    # --- Stage 3: pooling (grid over graphs) ---
    xnext, anext = pl.pallas_call(
        _pool_kernel,
        out_shape=(jax.ShapeDtypeStruct((B, K, H), jnp.float32),
                   jax.ShapeDtypeStruct((B, K, K), jnp.float32)),
        grid=(B,),
        in_specs=[pl.BlockSpec((None, N, K), lambda b: (b, 0, 0)),
                  pl.BlockSpec((None, N, H), lambda b: (b, 0, 0)),
                  pl.BlockSpec((None, N, N), lambda b: (b, 0, 0))],
        out_specs=(pl.BlockSpec((None, K, H), lambda b: (b, 0, 0)),
                   pl.BlockSpec((None, K, K), lambda b: (b, 0, 0))),
        compiler_params=pltpu.CompilerParams(dimension_semantics=("parallel",),
                                             vmem_limit_bytes=32 * 1024 * 1024),
        cost_estimate=pl.CostEstimate(
            flops=2 * B * N * K * H + 2 * B * N * N * K + 2 * B * N * K * K,
            transcendentals=0,
            bytes_accessed=4 * (B * N * (K + H + N) + B * K * (H + K))),
    )(s_l, z_l, adj)

    return xnext, anext, s_l, z_l


# ---------------------------------------------------------------------------
# Pure-JAX reference (mirrors the PyTorch forward literally, original matmul order)
# ---------------------------------------------------------------------------
def _reference(x, adj, w_e, b_e, w_a, b_a):
    def sage(w, b):
        h = jnp.einsum('bnm,bmf->bnf', adj, x)
        h = jnp.einsum('bnf,fk->bnk', h, w) + b
        nrm = jnp.sqrt(jnp.sum(h * h, axis=-1, keepdims=True))
        h = h / jnp.maximum(nrm, 1e-12)
        h = jnp.maximum(h, 0.0)
        mean = jnp.mean(h, axis=(0, 2), keepdims=True)
        var = jnp.mean((h - mean) ** 2, axis=(0, 2), keepdims=True)
        return (h - mean) / jnp.sqrt(var + 1e-5)

    z = sage(w_e, b_e)
    s = jax.nn.softmax(sage(w_a, b_a), axis=-1)
    xnext = jnp.einsum('bnk,bnh->bkh', s, z)
    anext = jnp.einsum('bnk,bnm,bmc->bkc', s, adj, s)
    return xnext, anext, s, z


if __name__ == "__main__":
    B, N = 2, 16              # graphs, nodes per graph
    nfeat, nhid, nnext = 32, 16, 8

    key = jax.random.PRNGKey(0)
    kx, kadj, kwe, kbe, kwa, kba = jax.random.split(key, 6)

    x = jax.random.normal(kx, (B, N, nfeat), dtype=jnp.float32)
    adj = jax.random.uniform(kadj, (B, N, N), dtype=jnp.float32)

    def make_linear(kw, kb, fan_in, fan_out):
        # Linear(fan_in -> fan_out): xavier_uniform(gain=sqrt(2)) weight, default torch bias.
        gain = jnp.sqrt(2.0)
        bw = gain * jnp.sqrt(6.0 / (fan_in + fan_out))
        w_torch = jax.random.uniform(kw, (fan_out, fan_in), jnp.float32, -bw, bw)
        bb = 1.0 / jnp.sqrt(float(fan_in))
        b = jax.random.uniform(kb, (fan_out,), jnp.float32, -bb, bb)
        return w_torch.T, b                          # kernel layout (F, out)

    w_e, b_e = make_linear(kwe, kbe, nfeat, nhid)
    w_a, b_a = make_linear(kwa, kba, nfeat, nnext)

    # node_tile=8 exercises a 2-step node grid even at this toy size.
    xnext, anext, s_l, z_l = batched_diff_pool(x, adj, w_e, b_e, w_a, b_a, node_tile=8)
    xnext, anext, s_l, z_l = jax.block_until_ready((xnext, anext, s_l, z_l))

    r_xnext, r_anext, r_s, r_z = _reference(x, adj, w_e, b_e, w_a, b_a)

    assert xnext.shape == (B, nnext, nhid) and anext.shape == (B, nnext, nnext)
    assert s_l.shape == (B, N, nnext) and z_l.shape == (B, N, nhid)
    # Tolerances allow for the EUP approximate reciprocal in the softmax and the
    # single-pass E[x^2]-mean^2 BatchNorm variance (both requested by the perf review).
    assert jnp.allclose(z_l, r_z, atol=5e-3, rtol=5e-3), "z_l mismatch vs reference"
    assert jnp.allclose(s_l, r_s, atol=1e-2, rtol=1e-2), "s_l mismatch vs reference"
    assert jnp.allclose(xnext, r_xnext, atol=2e-2, rtol=2e-2), "xnext mismatch vs reference"
    assert jnp.allclose(anext, r_anext, atol=2e-2, rtol=2e-2), "anext mismatch vs reference"
    # assignment rows sum to ~1
    assert jnp.allclose(jnp.sum(s_l, axis=-1), 1.0, atol=1e-2)

    print("KERNEL_OK")
</pallas_src>

<mosaic_0001>
module attributes {stable_mosaic.version = 11 : i64} {
  func.func @_xw_kernel(%arg0: i32, %arg1: memref<2x8x32xf32, #tpu.memory_space<vmem>>, %arg2: memref<32x16xf32, #tpu.memory_space<vmem>>, %arg3: memref<32x8xf32, #tpu.memory_space<vmem>>, %arg4: memref<2x8x16xf32, #tpu.memory_space<vmem>>, %arg5: memref<2x8x8xf32, #tpu.memory_space<vmem>>) attributes {dimension_semantics = [#tpu.dimension_semantics<parallel>], iteration_bounds = array<i64: 2>, scalar_prefetch = 0 : i64, scratch_operands = 0 : i64, tpu.core_type = #tpu.core_type<tc>, window_params = [{transform_indices = @transform_0, window_bounds = array<i64: 2, 8, 32>}, {pipeline_mode = #tpu.pipeline_mode<synchronous>, transform_indices = @transform_1, window_bounds = array<i64: 32, 16>}, {pipeline_mode = #tpu.pipeline_mode<synchronous>, transform_indices = @transform_2, window_bounds = array<i64: 32, 8>}, {transform_indices = @transform_3, window_bounds = array<i64: 2, 8, 16>}, {transform_indices = @transform_4, window_bounds = array<i64: 2, 8, 8>}]} {
    %c0 = arith.constant 0 : index
    %c0_0 = arith.constant 0 : index
    %c0_1 = arith.constant 0 : index
    %0 = vector.load %arg1[%c0, %c0_0, %c0_1] : memref<2x8x32xf32, #tpu.memory_space<vmem>>, vector<2x8x32xf32>
    %c0_2 = arith.constant 0 : index
    %c0_3 = arith.constant 0 : index
    %1 = vector.load %arg2[%c0_2, %c0_3] : memref<32x16xf32, #tpu.memory_space<vmem>>, vector<32x16xf32>
    "tpu.trace_start"() <{level = 10 : i32, message = "bnf,fh->bnh"}> : () -> ()
    %cst = arith.constant dense<0.000000e+00> : vector<2x8x16xf32>
    %2 = tpu.matmul %0, %1, %cst {dimension_numbers = #tpu.dot_dimension_numbers<[2], [0], [0, 1], [1], [0, 0, 0, 1, 1, 1], [], []>} : vector<2x8x32xf32>, vector<32x16xf32>, vector<2x8x16xf32> -> vector<2x8x16xf32>
    "tpu.trace_stop"() : () -> ()
    %c0_4 = arith.constant 0 : index
    %c0_5 = arith.constant 0 : index
    %c0_6 = arith.constant 0 : index
    %3 = vector.load %arg4[%c0_4, %c0_5, %c0_6] : memref<2x8x16xf32, #tpu.memory_space<vmem>>, vector<2x8x16xf32>
    tpu.vector_store %arg4[%c0_4, %c0_5, %c0_6], %2 {strides = array<i32>} : memref<2x8x16xf32, #tpu.memory_space<vmem>>, vector<2x8x16xf32>,
    %c0_7 = arith.constant 0 : index
    %c0_8 = arith.constant 0 : index
    %4 = vector.load %arg3[%c0_7, %c0_8] : memref<32x8xf32, #tpu.memory_space<vmem>>, vector<32x8xf32>
    "tpu.trace_start"() <{level = 10 : i32, message = "bnf,fk->bnk"}> : () -> ()
    %cst_9 = arith.constant dense<0.000000e+00> : vector<2x8x8xf32>
    %5 = tpu.matmul %0, %4, %cst_9 {dimension_numbers = #tpu.dot_dimension_numbers<[2], [0], [0, 1], [1], [0, 0, 0, 1, 1, 1], [], []>} : vector<2x8x32xf32>, vector<32x8xf32>, vector<2x8x8xf32> -> vector<2x8x8xf32>
    "tpu.trace_stop"() : () -> ()
    %c0_10 = arith.constant 0 : index
    %c0_11 = arith.constant 0 : index
    %c0_12 = arith.constant 0 : index
    %6 = vector.load %arg5[%c0_10, %c0_11, %c0_12] : memref<2x8x8xf32, #tpu.memory_space<vmem>>, vector<2x8x8xf32>
    tpu.vector_store %arg5[%c0_10, %c0_11, %c0_12], %5 {strides = array<i32>} : memref<2x8x8xf32, #tpu.memory_space<vmem>>, vector<2x8x8xf32>,
    return
  }
  func.func @transform_0(%arg0: i32) -> (i32, i32, i32) {
    %c0_i32 = arith.constant 0 : i32
    %c0_i32_0 = arith.constant 0 : i32
    %c0_i32_1 = arith.constant 0 : i32
    return %c0_i32, %arg0, %c0_i32_0 : i32, i32, i32
  }
  func.func @transform_1(%arg0: i32) -> (i32, i32) {
    %c0_i32 = arith.constant 0 : i32
    %c0_i32_0 = arith.constant 0 : i32
    %c0_i32_1 = arith.constant 0 : i32
    return %c0_i32, %c0_i32_0 : i32, i32
  }
  func.func @transform_2(%arg0: i32) -> (i32, i32) {
    %c0_i32 = arith.constant 0 : i32
    %c0_i32_0 = arith.constant 0 : i32
    %c0_i32_1 = arith.constant 0 : i32
    return %c0_i32, %c0_i32_0 : i32, i32
  }
  func.func @transform_3(%arg0: i32) -> (i32, i32, i32) {
    %c0_i32 = arith.constant 0 : i32
    %c0_i32_0 = arith.constant 0 : i32
    %c0_i32_1 = arith.constant 0 : i32
    return %c0_i32, %arg0, %c0_i32_0 : i32, i32, i32
  }
  func.func @transform_4(%arg0: i32) -> (i32, i32, i32) {
    %c0_i32 = arith.constant 0 : i32
    %c0_i32_0 = arith.constant 0 : i32
    %c0_i32_1 = arith.constant 0 : i32
    return %c0_i32, %arg0, %c0_i32_0 : i32, i32, i32
  }
}

</mosaic_0001>

<bundles_post_ra>
// kernel: tpu_custom_call.1
= control target key start
LH: loop header
LB: loop body
LE: loop exit
PB: predicated region body
PF: predicated region fallthrough
CT: control target
= control target key end

     0   :  { %10 = vsyncpa [#allocation4], 0  ;;  %s908_s0 = inlined_call_operand.vmem [shape: f32[2,16,32], index: 0, kind: input, shape index: {}]   ;;  %s909_s1 = inlined_call_operand.vmem [shape: f32[32,16], index: 1, kind: input, shape index: {}]   ;;  %s910_s2 = inlined_call_operand.vmem [shape: f32[32,8], index: 2, kind: input, shape index: {}]   ;;  %s911_s3 = inlined_call_operand.hbm [shape: f32[2,16,16], index: 3, kind: output, shape index: {0}]   ;;  %s912_s4 = inlined_call_operand.vmem [shape: f32[2,16,8], index: 4, kind: output, shape index: {1}]  }
   0x1   :  { %12 = vsyncpa [#allocation4 + $0x1], 0  ;;  %s756_s15 = smov 0   ;;  %s758_s16 = smov 0  }
   0x2   :  { %s760_s17 = smov 0   ;;  %s762_s18 = smov 0  }
   0x3 LB: > { %s777_s19 = sadd.s32 4294967295, %s725_s18   ;;  %s570_s20 = sadd.s32 4294967294, %s725_s18   ;;  %s725_s18 = sphi %s762_s18, %s918_s18   ;;  %s721_s17 = sphi %s760_s17, %s917_s17   ;;  %s717_s16 = sphi %s758_s16, %s916_s16   ;;  %s713_s15 = sphi %s756_s15, %s915_s15  }
   0x4   : > { %s781_s21 = sadd.s32 1, %s725_s18   ;;  %s25_s22 = sadd.s32 1, %s721_s17 }
   0x5   : > { %s22_s23 = ssub.s32 %s725_s18, %s781_s21  ;;  %p32_p0 = scmp.ne.s32.totalorder %s721_s17, %s717_s16 }
   0x6   : > { %p23_p1 = scmp.eq.s32.totalorder %s22_s23, 0  ;;  %p33_p2 = scmp.eq.s32.totalorder %s725_s18, 0 }
   0x7   : > { %p104_p3 = scmp.eq.s32.totalorder %s777_s19, 1  ;;  %p109_p4 = scmp.ne.s32.totalorder %s717_s16, %s713_s15 }
   0x8   : > { %s793_s24 = scalar_select %p23_p1, %s721_s17, %s25_s22  }
   0x9   : > { %p34_p5 = por %p33_p2, %p32_p0  ;;  %p795_p6 = por %p104_p3, %p32_p0 }
   0xa   : > { %p110_p7 = scmp.eq.s32.totalorder %s570_s20, 1  ;;  %p572_p9 = scmp.ge.s32.totalorder %s725_s18, 2 }
   0xc   : > { %p799_p8 = por %p110_p7, %p109_p4  ;;  %158 = sbr.rel (%p572_p9) target bundleno = 22 (0x16), region = 24 }
  0x11   : > { %161 = sbr.rel (!%p34_p5) target bundleno = 22 (0x16), region = 28  ;;  %s163_s27 = sand.u32 (%p34_p5), 1, %s721_s17  }
  0x12   : > { %s574_s28 = sshll.u32 (%p34_p5), %s725_s18, 3  ;;  %s573_s29 = sshll.u32 (%p34_p5), %s163_s27, 4 }
  0x13   : > { %s167_s6 = scalar_lea.vmem (%p34_p5), %s908_s0, %s574_s28  ;;  %s165_s7 = scalar_lea.vmem (%p34_p5), [#allocation2], %s573_s29 }
  0x14   : > { %v198_v0 = vld [vmem:[%s167_s6] sm:$0xff] (%p34_p5)  ;;  %v200_v1 = vld [vmem:[%s167_s6 + $0x10] sm:$0xff] (%p34_p5) }
  0x15   : > { %199 = vst [vmem:[%s165_s7] sm:$0xff] (%p34_p5), %v198_v0  ;;  %201 = vst [vmem:[%s165_s7 + $0x8] sm:$0xff] (%p34_p5), %v200_v1 }
  0x16 PF: > { %p575_p10 = scmp.ge.s32.totalorder %s725_s18, 1  ;;  %p206_p11 = scmp.lt.s32.totalorder %s725_s18, 3 }
  0x18   : > { %p207_p12 = pnand %p575_p10, %p206_p11 }
  0x19   : > { %s213_s14 = sand.u32 (!%p207_p12), 1, %s717_s16   ;;  %s585_s12 = sshll.u32 (!%p207_p12), %s777_s19, 7 }
  0x1a   : > { %210 = sbr.rel (%p207_p12) target bundleno = 255 (0xff), region = 66  ;;  %s828_s23 = sshll.u32 (!%p207_p12), %s213_s14, 4 }
  0x1b   : > { %s215_s9 = scalar_lea.vmem (!%p207_p12), [#allocation2], %s828_s23  ;;  %s235_s10 = scalar_lea.vmem (!%p207_p12), [#allocation3], %s828_s23 }
  0x1c   : > { %s432_s11 = sshll.u32 (!%p207_p12), %s235_s10, 4  ;;  %s850_s22 = scalar_lea.hbm (!%p207_p12), %s911_s3, %s585_s12  ;;  %s845_s11 = int_to_ptr.vmem [resolvable:$true] %s432_s11 }
  0x1d   : > { %s853_s27 = scalar_lea.vmem (!%p207_p12), [#allocation5], %s828_s23  ;;  %s859_s28 = scalar_lea.sflag (!%p207_p12), [#allocation4], %s213_s14 }
  0x1e   : > { %s665_s29 = scalar_lea.vmem (!%p207_p12), %s845_s11, 256  ;;  %s727_s30 = smov (!%p207_p12), [#allocation3]  }
  0x1f   : > { %v247_v2 = vld [vmem:[%s909_s1 + $0x18] sm:$0xff]  ;;  %v246_v4 = vld [vmem:[%s909_s1 + $0x10] sm:$0xff]  ;;  %v245_v6 = vld [vmem:[%s909_s1 + $0x8] sm:$0xff]  ;;  %vm248_vm0 = vcmask 261120   ;;  %vm330_vm1 = vcmask 130048   ;;  %vm412_vm2 = vcmask 64512   ;;  %p666_p13 = scmp.ne.s32.totalorder %s845_s11, %s665_s29 }
  0x20   : > { %v336_v3 = vld [vmem:[%s910_s2 + $0x18] sm:$0xff]  ;;  %601 = vmatprep.subr.mxu0 %v247_v2  ;;  %v335_v5 = vld [vmem:[%s910_s2 + $0x10] sm:$0xff]  ;;  %v334_v7 = vld [vmem:[%s910_s2 + $0x8] sm:$0xff]  ;;  %s669_s5 = sshll.u32 %s727_s30, 4  ;;  %s670_s5 = int_to_ptr.vmem [resolvable:$false] %s669_s5 }
  0x21   : > { %612 = vmatprep.subr.mxu1 %v336_v3  ;;  %602 = vmatpush3.msra.mxu0 %v247_v2  ;;  %v244_v8 = vld [vmem:[%s909_s1] sm:$0xff]  ;;  %v243_v11 = vld [vmem:[%s215_s9 + $0x8] sm:$0xff]  ;;  %p667_p0 = pnand %p666_p13, %p795_p6  ;;  %s671_s23 = scalar_lea.vmem %s670_s5, 512 }
  0x22   : > { %613 = vmatpush3.msra.mxu1 %v336_v3  ;;  %603 = vmatprep.subr.mxu0 %v246_v4  ;;  %v333_v9 = vld [vmem:[%s910_s2] sm:$0xff]  ;;  %p672_p2 = scmp.lt.s32.totalorder %s845_s11, %s670_s5  ;;  %p673_p3 = scmp.lt.s32.totalorder %s671_s23, %s665_s29 }
  0x23   : > { %614 = vmatprep.subr.mxu1 %v335_v5  ;;  %604 = vmatpush3.msra.mxu0 %v246_v4  ;;  %v242_v10 = vld [vmem:[%s215_s9] sm:$0xff]  ;;  %p668_p1 = pneg %p667_p0 }
  0x24   : > { %615 = vmatpush3.msra.mxu1 %v335_v5  ;;  %605 = vmatprep.subr.mxu0 %v245_v6  ;;  %p674_p4 = por %p673_p3, %p672_p2 }
  0x25   : > { %616 = vmatprep.subr.mxu1 %v334_v7  ;;  %606 = vmatpush3.msra.mxu0 %v245_v6 }
  0x26   : > { %617 = vmatpush3.msra.mxu1 %v334_v7  ;;  %607 = vmatprep.subr.mxu0 %v244_v8  ;;  %p675_p5 = pnand %p674_p4, %p668_p1 }
  0x27   : > { %618 = vmatprep.subr.mxu1 %v333_v9  ;;  %608 = vmatpush3.msra.mxu0 %v244_v8 }
  0x28   : > { %609 = vmatprep.mubr.msk.f32.mxu0 %vm248_vm0, %v242_v10  ;;  %619 = vmatpush3.msra.mxu1 %v333_v9 }
  0x29   : > { %620 = vmatprep.mubr.msk.f32.mxu1 %vm248_vm0, %v242_v10  ;;  %610 = vmatmul.mubr.msk.f32.vlgmr.msra.gmra.mxu0 %vm248_vm0, %v243_v11 }
  0x2a   : > { %621 = vmatmul.mubr.msk.f32.vlgmr.msra.gmra.mxu1 %vm248_vm0, %v243_v11 }
  0xe9   : > { %v611_v12 = vpop.f32.mrf.mxu0 }
  0xea   : > { %v622_v13 = vpop.f32.mrf.mxu1  ;;  %332 = vst.msk [vmem:[%s235_s10 + $0x8] sm:$0xff] %vm330_vm1, %v611_v12 }
  0xeb   : > { %414 = vst.msk [vmem:[%s853_s27 + $0x8] sm:$0xff] %vm412_vm2, %v622_v13  ;;  %v321_v14 = vpop.f32.mrf.mxu0 }
  0xec   : > { %v403_v15 = vpop.f32.mrf.mxu1  ;;  %331 = vst.msk [vmem:[%s235_s10] sm:$0xff] %vm330_vm1, %v321_v14 }
  0xed   : > { %413 = vst.msk [vmem:[%s853_s27] sm:$0xff] %vm412_vm2, %v403_v15 }
  0xee   : > { %678 = shalt.err (!%p675_p5)
}
  0xef   : > { %s679_s14 = scalar_lea.hbm %s850_s22, 256  ;;  %s683_s8 = scalar_lea.hbm %s911_s3, 512 }
  0xf0   : > { %p680_p7 = scmp.ne.s32.totalorder %s850_s22, %s679_s14  ;;  %p684_p12 = scmp.lt.s32.totalorder %s850_s22, %s911_s3 }
  0xf1   : > { %p685_p13 = scmp.lt.s32.totalorder %s683_s8, %s679_s14 }
  0xf2   : > { %p681_p10 = pnand %p680_p7, %p795_p6 }
  0xf3   : > { %p686_p0 = por %p685_p13, %p684_p12 }
  0xf4   : > { %p682_p11 = pneg %p681_p10 }
  0xf6   : > { %p687_p1 = pnand %p686_p0, %p682_p11 }
  0xf8   : > { %690 = shalt.err (!%p687_p1)
}
  0xf9   : > { %s728_s12 = smov 128   ;;  %s729_s13 = smov 256   ;;  %v474_v16 = vld [vmem:[%s853_s27] sm:$0xff] (%p795_p6)  ;;  %v476_v17 = vld [vmem:[%s853_s27 + $0x8] sm:$0xff] (%p795_p6) }
  0xfa   : > { %s730_s20 = smov 8   ;;  %441 = sbr.rel (!%p795_p6) target bundleno = 255 (0xff), region = 78 }
  0xfb   : > { %623 = dma.vmem_to_hbm [thread:$0]  (%p795_p6), %s845_s11, 256, %s850_s22, %s859_s28, %s728_s12, %s729_s13, %s730_s20  }
  0xfc   : > { %s586_s29 = sshll.u32 (%p795_p6), %s777_s19, 3 }
  0xfd   : > { %s443_s23 = scalar_lea.vmem (%p795_p6), %s912_s4, %s586_s29 }
  0xfe   : > { %475 = vst [vmem:[%s443_s23] sm:$0xff] (%p795_p6), %v474_v16  ;;  %477 = vst [vmem:[%s443_s23 + $0x10] sm:$0xff] (%p795_p6), %v476_v17 }
  0xff PF: > { %s489_s11 = sand.u32 1, %s713_s15   ;;  %p626_p6 = pnand %p572_p9, %p799_p8 }
 0x100   : > { %s490_s25 = scalar_lea.sflag [#allocation4], %s489_s11 }
 0x101   : > { %p627_p2 = pneg %p626_p6 }
 0x103   : > { %708 = dma.done.wait (%p627_p2), %s490_s25, 256  }
 0x104   : > { %710 = vsyncadd (%p627_p2), %s490_s25, 4294967040  ;;  %p15_p3 = scmp.ge.s32.totalorder %s781_s21, 4   ;;  %s915_s15 = smov %s717_s16 }
 0x105   : > { %s916_s16 = smov %s721_s17  ;;  %s917_s17 = smov %s793_s24 }
 0x106   : > { %s918_s18 = smov %s781_s21  ;;  %17 = sbr.rel (!%p15_p3) target bundleno = 3 (0x3), region = 160 }
 0x10b   :  { %502 = vsyncpa [#allocation4], 1 }
 0x10c   :  { %504 = vsyncpa [#allocation4 + $0x1], 1 }

</bundles_post_ra>
